<compile_context>
chip_gen: v7x
topology: tpu7x:2x2x1
jax: 0.10.0
libtpu: 0.0.40
codegen_flags: <defaults>
</compile_context>

<pallas_src>
import functools

import jax
import jax.numpy as jnp
from jax.experimental import pallas as pl
from jax.experimental.pallas import tpu as pltpu

_BN_EPS = 1e-5
_LRELU_SLOPE = 0.01


# ----------------------------------------------------------------------------
# Single fused kernel for the entire MLP
# ----------------------------------------------------------------------------
def _mlp_kernel(num_layers, state_size, hidden, batch,
                x_ref, w_ref, gb_ref, head_ref, o_ref):
    """x_ref   : (B, state_size)            f32
       w_ref   : (L, in_pad, hidden)        bf16 (pre-transposed, zero-padded)
       gb_ref  : (2*L, hidden)              f32  (rows: gamma_i, beta_i, ...)
       head_ref: (hidden + 1, action)       f32  (weight rows + bias row)
       o_ref   : (B, action)                f32
    """
    inv_b = 1.0 / float(batch)  # compile-time constant
    y = x_ref[...]              # (B, state_size) f32

    for i in range(num_layers):
        k = state_size if i == 0 else hidden
        w = w_ref[i, :k, :]                                  # (k, hidden) bf16
        # Linear (MXU, bf16 inputs, f32 accumulation); bias omitted — it is
        # cancelled exactly by the BatchNorm mean subtraction below.
        h = jnp.dot(y.astype(jnp.bfloat16), w,
                    preferred_element_type=jnp.float32)      # (B, hidden) f32

        # BatchNorm1d, training mode: two independent reductions (sum, sum sq).
        s1 = jnp.sum(h, axis=0, keepdims=True)
        s2 = jnp.sum(h * h, axis=0, keepdims=True)
        mean = s1 * inv_b
        var = jnp.maximum(s2 * inv_b - mean * mean, 0.0)     # biased variance
        gamma = gb_ref[2 * i:2 * i + 1, :]
        beta = gb_ref[2 * i + 1:2 * i + 2, :]
        scale = gamma * jax.lax.rsqrt(var + _BN_EPS)          # rsqrt -> EUP
        shift = beta - scale * mean
        z = scale * h + shift

        # LeakyReLU(0.01)
        y = jnp.where(z >= 0, z, _LRELU_SLOPE * z)

    # Final Linear head (weight rows cast to bf16 for the MXU, f32 bias add).
    w_out = head_ref[:hidden, :].astype(jnp.bfloat16)
    b_out = head_ref[hidden:hidden + 1, :]
    o_ref[...] = jnp.dot(y.astype(jnp.bfloat16), w_out,
                         preferred_element_type=jnp.float32) + b_out

    # TODO(synk): BatchNorm1d running_mean/running_var buffer updates (a
    # training-mode side effect in PyTorch) are not computed/returned.


# ----------------------------------------------------------------------------
# Wrapper: one pallas_call for the whole network (everything fits in VMEM)
# ----------------------------------------------------------------------------
def _vmem_spec():
    return pl.BlockSpec(memory_space=pltpu.MemorySpace.VMEM)


def mlp_forward(x, w_slab, gb_slab, head_slab):
    batch, state_size = x.shape
    num_layers, _, hidden = w_slab.shape
    action_size = head_slab.shape[1]

    kernel = functools.partial(_mlp_kernel, num_layers, state_size, hidden,
                               batch)
    return pl.pallas_call(
        kernel,
        out_shape=jax.ShapeDtypeStruct((batch, action_size), jnp.float32),
        in_specs=[_vmem_spec()] * 4,
        out_specs=_vmem_spec(),
    )(x, w_slab, gb_slab, head_slab)


@jax.jit
def forward(x, w_slab, gb_slab, head_slab):
    return mlp_forward(x, w_slab, gb_slab, head_slab)


# ----------------------------------------------------------------------------
# Parameter init (PyTorch Linear-style uniform; BN gamma=1, beta=0)
# Hidden-layer Linear biases are not materialized: they are mathematically
# cancelled by training-mode BatchNorm, so the forward output is unchanged.
# ----------------------------------------------------------------------------
def init_params(key, state_size, hidden_layer_dim, action_size, num_layers):
    in_pad = max(state_size, hidden_layer_dim)
    w_slab = jnp.zeros((num_layers, in_pad, hidden_layer_dim), jnp.float32)
    gb_rows = []
    in_dim = state_size
    for i in range(num_layers):
        key, kw = jax.random.split(key)
        bound = 1.0 / float(in_dim) ** 0.5
        w = jax.random.uniform(
            kw, (in_dim, hidden_layer_dim), jnp.float32, -bound, bound)
        w_slab = w_slab.at[i, :in_dim, :].set(w)
        gb_rows.append(jnp.ones((1, hidden_layer_dim), jnp.float32))   # gamma
        gb_rows.append(jnp.zeros((1, hidden_layer_dim), jnp.float32))  # beta
        in_dim = hidden_layer_dim
    gb_slab = jnp.concatenate(gb_rows, axis=0)                # (2L, hidden)

    key, kw, kb = jax.random.split(key, 3)
    bound = 1.0 / float(hidden_layer_dim) ** 0.5
    w_out = jax.random.uniform(
        kw, (hidden_layer_dim, action_size), jnp.float32, -bound, bound)
    b_out = jax.random.uniform(kb, (1, action_size), jnp.float32, -bound,
                               bound)
    head_slab = jnp.concatenate([w_out, b_out], axis=0)       # (hidden+1, A)

    return w_slab.astype(jnp.bfloat16), gb_slab, head_slab


# ----------------------------------------------------------------------------
# Pure-JAX reference (f32 everywhere) for a sanity check
# ----------------------------------------------------------------------------
def _reference(x, w_slab, gb_slab, head_slab, state_size, hidden, num_layers):
    y = x
    w_f32 = w_slab.astype(jnp.float32)
    for i in range(num_layers):
        k = state_size if i == 0 else hidden
        h = y @ w_f32[i, :k, :]
        mean = jnp.mean(h, axis=0, keepdims=True)
        var = jnp.mean((h - mean) ** 2, axis=0, keepdims=True)
        xhat = (h - mean) * jax.lax.rsqrt(var + _BN_EPS)
        z = gb_slab[2 * i] * xhat + gb_slab[2 * i + 1]
        y = jnp.where(z >= 0, z, _LRELU_SLOPE * z)
    return y @ head_slab[:hidden, :] + head_slab[hidden:hidden + 1, :]


if __name__ == "__main__":
    # Small shapes consistent with the DDQN module's forward pass.
    batch = 8
    state_size = 16
    hidden_layer_dim = 32
    action_size = 4
    num_layers = 2

    key = jax.random.PRNGKey(0)
    key, kx, kp = jax.random.split(key, 3)
    x = jax.random.normal(kx, (batch, state_size), jnp.float32)
    w_slab, gb_slab, head_slab = init_params(
        kp, state_size, hidden_layer_dim, action_size, num_layers)

    out = forward(x, w_slab, gb_slab, head_slab)
    jax.block_until_ready(out)

    assert out.shape == (batch, action_size)
    assert bool(jnp.all(jnp.isfinite(out)))

    ref = _reference(x, w_slab, gb_slab, head_slab, state_size,
                     hidden_layer_dim, num_layers)
    assert bool(jnp.max(jnp.abs(out - ref)) < 0.1), "kernel mismatch vs ref"

    print("KERNEL_OK")
</pallas_src>

<mosaic_0001>
module attributes {stable_mosaic.version = 11 : i64} {
  func.func @_mlp_kernel(%arg0: memref<8x16xf32, #tpu.memory_space<vmem>>, %arg1: memref<2x32x32xbf16, #tpu.memory_space<vmem>>, %arg2: memref<4x32xf32, #tpu.memory_space<vmem>>, %arg3: memref<33x4xf32, #tpu.memory_space<vmem>>, %arg4: memref<8x4xf32, #tpu.memory_space<vmem>>) attributes {dimension_semantics = [], scalar_prefetch = 0 : i64, scratch_operands = 0 : i64, tpu.core_type = #tpu.core_type<tc>} {
    %c0 = arith.constant 0 : index
    %c0_0 = arith.constant 0 : index
    %0 = vector.load %arg0[%c0, %c0_0] : memref<8x16xf32, #tpu.memory_space<vmem>>, vector<8x16xf32>
    %c0_1 = arith.constant 0 : index
    %c0_2 = arith.constant 0 : index
    %c0_3 = arith.constant 0 : index
    %1 = vector.load %arg1[%c0_1, %c0_2, %c0_3] : memref<2x32x32xbf16, #tpu.memory_space<vmem>>, vector<1x16x32xbf16>
    %2 = vector.shape_cast %1 : vector<1x16x32xbf16> to vector<16x32xbf16>
    %3 = arith.truncf %0 : vector<8x16xf32> to vector<8x16xbf16>
    %cst = arith.constant dense<0.000000e+00> : vector<8x32xf32>
    %4 = tpu.matmul %3, %2, %cst {dimension_numbers = #tpu.dot_dimension_numbers<[1], [0], [0], [1], [0, 0, 1, 1], [], []>} : vector<8x16xbf16>, vector<16x32xbf16>, vector<8x32xf32> -> vector<8x32xf32>
    %cst_4 = arith.constant dense<0.000000e+00> : vector<32xf32>
    %5 = vector.multi_reduction <add>, %4, %cst_4 [0] : vector<8x32xf32> to vector<32xf32>
    %6 = vector.shape_cast %5 : vector<32xf32> to vector<1x32xf32>
    %7 = arith.mulf %4, %4 : vector<8x32xf32>
    %cst_5 = arith.constant dense<0.000000e+00> : vector<32xf32>
    %8 = vector.multi_reduction <add>, %7, %cst_5 [0] : vector<8x32xf32> to vector<32xf32>
    %9 = vector.shape_cast %8 : vector<32xf32> to vector<1x32xf32>
    %cst_6 = arith.constant 1.250000e-01 : f32
    %10 = vector.broadcast %cst_6 : f32 to vector<1x32xf32>
    %11 = arith.mulf %6, %10 : vector<1x32xf32>
    %cst_7 = arith.constant 1.250000e-01 : f32
    %12 = vector.broadcast %cst_7 : f32 to vector<1x32xf32>
    %13 = arith.mulf %9, %12 : vector<1x32xf32>
    %14 = arith.mulf %11, %11 : vector<1x32xf32>
    %15 = arith.subf %13, %14 : vector<1x32xf32>
    %cst_8 = arith.constant 0.000000e+00 : f32
    %16 = vector.broadcast %cst_8 : f32 to vector<1x32xf32>
    %17 = arith.maximumf %15, %16 : vector<1x32xf32>
    %c0_9 = arith.constant 0 : index
    %c0_10 = arith.constant 0 : index
    %18 = vector.load %arg2[%c0_9, %c0_10] : memref<4x32xf32, #tpu.memory_space<vmem>>, vector<1x32xf32>
    %c1 = arith.constant 1 : index
    %c0_11 = arith.constant 0 : index
    %19 = vector.load %arg2[%c1, %c0_11] : memref<4x32xf32, #tpu.memory_space<vmem>>, vector<1x32xf32>
    %cst_12 = arith.constant 9.99999974E-6 : f32
    %20 = vector.broadcast %cst_12 : f32 to vector<1x32xf32>
    %21 = arith.addf %17, %20 : vector<1x32xf32>
    %22 = math.rsqrt %21 : vector<1x32xf32>
    %23 = arith.mulf %18, %22 : vector<1x32xf32>
    %24 = arith.mulf %23, %11 : vector<1x32xf32>
    %25 = arith.subf %19, %24 : vector<1x32xf32>
    %26 = vector.broadcast %23 : vector<1x32xf32> to vector<8x32xf32>
    %27 = arith.mulf %26, %4 : vector<8x32xf32>
    %28 = vector.broadcast %25 : vector<1x32xf32> to vector<8x32xf32>
    %29 = arith.addf %27, %28 : vector<8x32xf32>
    %cst_13 = arith.constant 0.000000e+00 : f32
    %30 = vector.broadcast %cst_13 : f32 to vector<8x32xf32>
    %31 = arith.cmpf oge, %29, %30 : vector<8x32xf32>
    %cst_14 = arith.constant 0.00999999977 : f32
    %32 = vector.broadcast %cst_14 : f32 to vector<8x32xf32>
    %33 = arith.mulf %32, %29 : vector<8x32xf32>
    %34 = arith.select %31, %29, %33 : vector<8x32xi1>, vector<8x32xf32>
    %c1_15 = arith.constant 1 : index
    %c0_16 = arith.constant 0 : index
    %c0_17 = arith.constant 0 : index
    %35 = vector.load %arg1[%c1_15, %c0_16, %c0_17] : memref<2x32x32xbf16, #tpu.memory_space<vmem>>, vector<1x32x32xbf16>
    %36 = vector.shape_cast %35 : vector<1x32x32xbf16> to vector<32x32xbf16>
    %37 = arith.truncf %34 : vector<8x32xf32> to vector<8x32xbf16>
    %cst_18 = arith.constant dense<0.000000e+00> : vector<8x32xf32>
    %38 = tpu.matmul %37, %36, %cst_18 {dimension_numbers = #tpu.dot_dimension_numbers<[1], [0], [0], [1], [0, 0, 1, 1], [], []>} : vector<8x32xbf16>, vector<32x32xbf16>, vector<8x32xf32> -> vector<8x32xf32>
    %cst_19 = arith.constant dense<0.000000e+00> : vector<32xf32>
    %39 = vector.multi_reduction <add>, %38, %cst_19 [0] : vector<8x32xf32> to vector<32xf32>
    %40 = vector.shape_cast %39 : vector<32xf32> to vector<1x32xf32>
    %41 = arith.mulf %38, %38 : vector<8x32xf32>
    %cst_20 = arith.constant dense<0.000000e+00> : vector<32xf32>
    %42 = vector.multi_reduction <add>, %41, %cst_20 [0] : vector<8x32xf32> to vector<32xf32>
    %43 = vector.shape_cast %42 : vector<32xf32> to vector<1x32xf32>
    %cst_21 = arith.constant 1.250000e-01 : f32
    %44 = vector.broadcast %cst_21 : f32 to vector<1x32xf32>
    %45 = arith.mulf %40, %44 : vector<1x32xf32>
    %cst_22 = arith.constant 1.250000e-01 : f32
    %46 = vector.broadcast %cst_22 : f32 to vector<1x32xf32>
    %47 = arith.mulf %43, %46 : vector<1x32xf32>
    %48 = arith.mulf %45, %45 : vector<1x32xf32>
    %49 = arith.subf %47, %48 : vector<1x32xf32>
    %cst_23 = arith.constant 0.000000e+00 : f32
    %50 = vector.broadcast %cst_23 : f32 to vector<1x32xf32>
    %51 = arith.maximumf %49, %50 : vector<1x32xf32>
    %c2 = arith.constant 2 : index
    %c0_24 = arith.constant 0 : index
    %52 = vector.load %arg2[%c2, %c0_24] : memref<4x32xf32, #tpu.memory_space<vmem>>, vector<1x32xf32>
    %c3 = arith.constant 3 : index
    %c0_25 = arith.constant 0 : index
    %53 = vector.load %arg2[%c3, %c0_25] : memref<4x32xf32, #tpu.memory_space<vmem>>, vector<1x32xf32>
    %cst_26 = arith.constant 9.99999974E-6 : f32
    %54 = vector.broadcast %cst_26 : f32 to vector<1x32xf32>
    %55 = arith.addf %51, %54 : vector<1x32xf32>
    %56 = math.rsqrt %55 : vector<1x32xf32>
    %57 = arith.mulf %52, %56 : vector<1x32xf32>
    %58 = arith.mulf %57, %45 : vector<1x32xf32>
    %59 = arith.subf %53, %58 : vector<1x32xf32>
    %60 = vector.broadcast %57 : vector<1x32xf32> to vector<8x32xf32>
    %61 = arith.mulf %60, %38 : vector<8x32xf32>
    %62 = vector.broadcast %59 : vector<1x32xf32> to vector<8x32xf32>
    %63 = arith.addf %61, %62 : vector<8x32xf32>
    %cst_27 = arith.constant 0.000000e+00 : f32
    %64 = vector.broadcast %cst_27 : f32 to vector<8x32xf32>
    %65 = arith.cmpf oge, %63, %64 : vector<8x32xf32>
    %cst_28 = arith.constant 0.00999999977 : f32
    %66 = vector.broadcast %cst_28 : f32 to vector<8x32xf32>
    %67 = arith.mulf %66, %63 : vector<8x32xf32>
    %68 = arith.select %65, %63, %67 : vector<8x32xi1>, vector<8x32xf32>
    %c0_29 = arith.constant 0 : index
    %c0_30 = arith.constant 0 : index
    %69 = vector.load %arg3[%c0_29, %c0_30] : memref<33x4xf32, #tpu.memory_space<vmem>>, vector<32x4xf32>
    %70 = arith.truncf %69 : vector<32x4xf32> to vector<32x4xbf16>
    %c32 = arith.constant 32 : index
    %c0_31 = arith.constant 0 : index
    %71 = vector.load %arg3[%c32, %c0_31] : memref<33x4xf32, #tpu.memory_space<vmem>>, vector<1x4xf32>
    %72 = arith.truncf %68 : vector<8x32xf32> to vector<8x32xbf16>
    %cst_32 = arith.constant dense<0.000000e+00> : vector<8x4xf32>
    %73 = tpu.matmul %72, %70, %cst_32 {dimension_numbers = #tpu.dot_dimension_numbers<[1], [0], [0], [1], [0, 0, 1, 1], [], []>} : vector<8x32xbf16>, vector<32x4xbf16>, vector<8x4xf32> -> vector<8x4xf32>
    %74 = vector.broadcast %71 : vector<1x4xf32> to vector<8x4xf32>
    %75 = arith.addf %73, %74 : vector<8x4xf32>
    %c0_33 = arith.constant 0 : index
    %c0_34 = arith.constant 0 : index
    %76 = vector.load %arg4[%c0_33, %c0_34] : memref<8x4xf32, #tpu.memory_space<vmem>>, vector<8x4xf32>
    tpu.vector_store %arg4[%c0_33, %c0_34], %75 {strides = array<i32>} : memref<8x4xf32, #tpu.memory_space<vmem>>, vector<8x4xf32>,
    return
  }
}

</mosaic_0001>

<bundles_post_ra>
// kernel: forward.1
= control target key start
LH: loop header
LB: loop body
LE: loop exit
PB: predicated region body
PF: predicated region fallthrough
CT: control target
= control target key end

     0   :  { %v325_v0 = vmov 0.0   ;;  %vm326_vm0 = vmmov 0   ;;  %vm28_vm1 = vcmask 130048   ;;  %vm72_vm2 = vcmask 261120   ;;  %s408_s1 = inlined_call_operand.vmem [shape: bf16[2,32,32], index: 1, kind: input, shape index: {}]   ;;  %s409_s0 = inlined_call_operand.vmem [shape: f32[8,16], index: 0, kind: input, shape index: {}]   ;;  %s410_s2 = inlined_call_operand.vmem [shape: f32[4,32], index: 2, kind: input, shape index: {}]   ;;  %s411_s3 = inlined_call_operand.vmem [shape: f32[33,4], index: 3, kind: input, shape index: {}]   ;;  %s412_s4 = inlined_call_operand.vmem [shape: f32[8,4], index: 4, kind: output, shape index: {}]  }
   0x1   :  { %294 = vmatprep.subr.bf16.mxu0 %v325_v0  ;;  %v318_v1 = vld [vmem:[%s408_s1] sm:$0xff]   ;;  %296 = vmatprep.mubr.msk.bf16.mxu0 %vm326_vm0, %v325_v0  ;;  %v319_v4 = vld [vmem:[%s408_s1 + $0x10] sm:$0xff]   ;;  %v320_v5 = vld [vmem:[%s408_s1 + $0x18] sm:$0xff]   ;;  %v100_v31 = vlaneseq  ;;  %vm269_vm5 = vcmask 31744  }
   0x2   :  { %v18_v2 = vld [vmem:[%s409_s0] sm:$0xff]  ;;  %300 = vmatprep.subr.bf16.mxu1 %v325_v0  ;;  %304 = vmatprep.mubr.msk.bf16.mxu1 %vm326_vm0, %v325_v0  ;;  %v215_v48 = vld [vmem:[%s411_s3 + $0x8] sm:$0xff]  ;;  %v216_v50 = vld [vmem:[%s411_s3 + $0x10] sm:$0xff] }
   0x3   :  { %295 = vmatpush3.bf16.msra.mxu0 %v318_v1  ;;  %v21_v3 = vpack.c.bf16 %v18_v2, %v18_v2  ;;  %301 = vmatpush3.bf16.msra.mxu1 %v319_v4  ;;  %v101_v32 = vshrl.u32 %v100_v31, 7  ;;  %v93_v33 = vld [vmem:[%s410_s2] sm:$0x1]  ;;  %v94_v37 = vld [vmem:[%s410_s2 + $0x1] sm:$0x1]  ;;  %v217_v51 = vld [vmem:[%s411_s3 + $0x18] sm:$0xff] }
   0x4   :  { %308 = vmatprep.subr.bf16.mxu0 %v325_v0  ;;  %302 = vmatprep.subr.bf16.mxu1 %v325_v0  ;;  %v214_v47 = vld [vmem:[%s411_s3] sm:$0xff]  ;;  %v219_v52 = vpack.c.bf16 %v217_v51, %v216_v50 }
   0x5   :  { %v102_v34 = vsub.s32 0, %v101_v32  ;;  %v218_v49 = vpack.c.bf16 %v215_v48, %v214_v47 }
   0x6   :  { %297 = vmatmul.mubr.msk.bf16.vlgmr.msra.gmra.mrb[0].mxu0 %vm28_vm1, %v21_v3 }
   0x7   :  { %312 = vmatprep.mubr.msk.bf16.mxu0 %vm326_vm0, %v325_v0  ;;  %303 = vmatpush3.bf16.msra.mxu1 %v320_v5 }
   0x8   :  { %309 = vmatpush3.bf16.msra.mxu0 %v218_v49 }
   0x9   :  { %310 = vmatprep.subr.bf16.mxu0 %v325_v0 }
   0xc   :  { %311 = vmatpush3.bf16.msra.mxu0 %v219_v52 }
  0xd9   :  { %v66_v6 = vpop.f32.mrb[0].mxu0 }
  0xda   :  { %v73_v7 = vsel %vm72_vm2, %v66_v6, 0.0  ;;  %v80_v8 = vmul.f32 %v66_v6, %v66_v6  ;;  %v298_v9 = vpop.f32.mrb[1].mxu0 }
  0xdb   :  { %v74_v10 = vrot.slane %v73_v7, 4  ;;  %v69_v11 = vpop.f32.mrb[2].mxu0 }
  0xdc   :  { %v81_v12 = vsel %vm72_vm2, %v80_v8, 0.0  ;;  %v299_v13 = vpop.f32.mrb[3].mxu0 }
  0xdd   :  { %v75_v14 = vadd.f32 %v74_v10, %v73_v7  ;;  %v82_v15 = vrot.slane %v81_v12, 4 }
  0xdf   :  { %v76_v16 = vrot.slane %v75_v14, 2  ;;  %v83_v17 = vadd.f32 %v82_v15, %v81_v12 }
  0xe1   :  { %v77_v18 = vadd.f32 %v76_v16, %v75_v14  ;;  %v84_v19 = vrot.slane %v83_v17, 2  ;;  %v194_v14 = vld [vmem:[%s410_s2 + $0x2] sm:$0x1] }
  0xe3   :  { %v78_v20 = vrot.slane %v77_v18, 1  ;;  %v85_v21 = vadd.f32 %v84_v19, %v83_v17  ;;  %v195_v17 = vld [vmem:[%s410_s2 + $0x3] sm:$0x1] }
  0xe5   :  { %v79_v22 = vadd.f32 %v78_v20, %v77_v18  ;;  %v86_v23 = vrot.slane %v85_v21, 1 }
  0xe7   :  { %v87_v24 = vadd.f32 %v86_v23, %v85_v21  ;;  %v88_v25 = vmul.f32 0.125, %v79_v22 }
  0xe9   :  { %v89_v26 = vmul.f32 0.125, %v87_v24  ;;  %v90_v27 = vmul.f32 %v88_v25, %v88_v25 }
  0xeb   :  { %v91_v28 = vsub.f32 %v89_v26, %v90_v27  ;;  %v284_v27 = vld [vmem:[%s411_s3 + $0x20] ss:$0 sm:$0xff] }
  0xed   :  { %v92_v29 = vmax.f32 %v91_v28, 0.0 }
  0xef   :  { %v95_v30 = vadd.f32 1e-05, %v92_v29 }
  0xf1   :  { %321 = vrsqrt.f32 %v95_v30 }
  0xfb   :  { %v322_v35 = vpop.eup %321 }
  0xfc   :  { %v97_v36 = vmul.f32 %v322_v35, %v93_v33 }
  0xfe   :  { %v98_v38 = vmul.f32 %v97_v36, %v88_v25  ;;  %v103_v39 = vrot.slane %v97_v36, %v102_v34 }
 0x100   :  { %v99_v40 = vsub.f32 %v94_v37, %v98_v38  ;;  %v104_v41 = vmul.f32 %v103_v39, %v66_v6 }
 0x102   :  { %v108_v42 = vrot.slane %v99_v40, %v102_v34 }
 0x104   :  { %v109_v43 = vadd.f32 %v108_v42, %v104_v41 }
 0x106   :  { %v111_v44 = vmul.f32 0.01, %v109_v43  ;;  %vm110_vm3 = vcmp.ge.f32.partialorder %v109_v43, 0.0 }
 0x108   :  { %v112_v45 = vsel %vm110_vm3, %v109_v43, %v111_v44 }
 0x109   :  { %v118_v46 = vpack.c.bf16 %v112_v45, %v112_v45 }
 0x10b   :  { %305 = vmatmul.mubr.msk.bf16.vlgmr.msra.gmra.mrb[0].mxu1 %vm72_vm2, %v118_v46 }
 0x1de   :  { %v168_v53 = vpop.f32.mrb[0].mxu1 }
 0x1df   :  { %v174_v54 = vsel %vm72_vm2, %v168_v53, 0.0  ;;  %v181_v55 = vmul.f32 %v168_v53, %v168_v53  ;;  %v306_v56 = vpop.f32.mrb[1].mxu1 }
 0x1e0   :  { %v175_v57 = vrot.slane %v174_v54, 4  ;;  %v171_v58 = vpop.f32.mrb[2].mxu1 }
 0x1e1   :  { %v182_v59 = vsel %vm72_vm2, %v181_v55, 0.0  ;;  %v307_v60 = vpop.f32.mrb[3].mxu1 }
 0x1e2   :  { %v176_v61 = vadd.f32 %v175_v57, %v174_v54  ;;  %v183_v62 = vrot.slane %v182_v59, 4 }
 0x1e4   :  { %v177_v63 = vrot.slane %v176_v61, 2  ;;  %v184_v0 = vadd.f32 %v183_v62, %v182_v59 }
 0x1e6   :  { %v178_v1 = vadd.f32 %v177_v63, %v176_v61  ;;  %v185_v2 = vrot.slane %v184_v0, 2 }
 0x1e8   :  { %v179_v3 = vrot.slane %v178_v1, 1  ;;  %v186_v4 = vadd.f32 %v185_v2, %v184_v0 }
 0x1ea   :  { %v180_v5 = vadd.f32 %v179_v3, %v178_v1  ;;  %v187_v6 = vrot.slane %v186_v4, 1 }
 0x1ec   :  { %v188_v7 = vadd.f32 %v187_v6, %v186_v4  ;;  %v189_v8 = vmul.f32 0.125, %v180_v5 }
 0x1ee   :  { %v190_v9 = vmul.f32 0.125, %v188_v7  ;;  %v191_v10 = vmul.f32 %v189_v8, %v189_v8 }
 0x1f0   :  { %v192_v11 = vsub.f32 %v190_v9, %v191_v10 }
 0x1f2   :  { %v193_v12 = vmax.f32 %v192_v11, 0.0 }
 0x1f4   :  { %v196_v13 = vadd.f32 1e-05, %v193_v12 }
 0x1f6   :  { %323 = vrsqrt.f32 %v196_v13 }
 0x200   :  { %v324_v15 = vpop.eup %323 }
 0x201   :  { %v198_v16 = vmul.f32 %v324_v15, %v194_v14 }
 0x203   :  { %v199_v18 = vmul.f32 %v198_v16, %v189_v8  ;;  %v204_v19 = vrot.slane %v198_v16, %v102_v34 }
 0x205   :  { %v200_v20 = vsub.f32 %v195_v17, %v199_v18  ;;  %v205_v21 = vmul.f32 %v204_v19, %v168_v53 }
 0x207   :  { %v209_v22 = vrot.slane %v200_v20, %v102_v34 }
 0x209   :  { %v210_v23 = vadd.f32 %v209_v22, %v205_v21 }
 0x20b   :  { %vm211_vm4 = vcmp.ge.f32.partialorder %v210_v23, 0.0  ;;  %v212_v24 = vmul.f32 0.01, %v210_v23 }
 0x20d   :  { %v213_v25 = vsel %vm211_vm4, %v210_v23, %v212_v24 }
 0x20e   :  { %v221_v26 = vpack.c.bf16 %v213_v25, %v213_v25 }
 0x210   :  { %313 = vmatmul.mubr.msk.bf16.vlgmr.msra.gmra.mrb[4].mxu0 %vm72_vm2, %v221_v26 }
 0x2e3   :  { %v263_v28 = vpop.f32.mrb[4].mxu0 }
 0x2e4   :  { %v264_v29 = vadd.f32 %v284_v27, %v263_v28  ;;  %v314_v30 = vpop.f32.mrb[5].mxu0 }
 0x2e5   :  { %v266_v31 = vpop.f32.mrb[6].mxu0 }
 0x2e6   :  { %270 = vst.msk [vmem:[%s412_s4] sm:$0xff] %vm269_vm5, %v264_v29  ;;  %v315_v32 = vpop.f32.mrb[7].mxu0 }

</bundles_post_ra>
